<compile_context>
chip_gen: v7x
topology: tpu7x:2x2x1
jax: 0.10.0
libtpu: 0.0.40
codegen_flags: <defaults>
</compile_context>

<pallas_src>
import jax
import jax.numpy as jnp
from jax.experimental import pallas as pl
from jax.experimental.pallas import tpu as pltpu

# cfg.px_num is not given; use px_num = 2 -> c = 4**2 = 16 input channels.
PX_NUM = 2
C = 4 ** PX_NUM          # input channels
N = 4                    # bin factor
G = C // N               # output channels


def _cdiv(a, b):
    return (a + b - 1) // b


def _binning_kernel(w_ref, x_ref, o_ref):
    # w_ref: SMEM (N, G) weights with w_ref[j, i] = groupn[i, j]
    # x_ref: VMEM input block, (N, G, S, 128) [dense path] or (N, G, T)
    # o_ref: VMEM output block, (G, S, 128) or (G, T)
    for i in range(G):
        acc = x_ref[0, i] * w_ref[0, i]           # scalar-broadcast multiply (VPU)
        for j in range(1, N):
            acc = acc + x_ref[j, i] * w_ref[j, i]
        o_ref[i] = acc.astype(o_ref.dtype)


def _pick_sublane_block(s_total, batch, target=512):
    """Spatial block in 128-lane rows: full extent or a multiple of 8, capped
    at `target` (= 65536 lanes); shrunk so the parallel grid has >= 2 steps
    when possible (v7x megacore)."""
    s_blk = s_total if s_total <= target else target   # target is a multiple of 8
    while batch * _cdiv(s_total, s_blk) < 2 and s_blk > 8:
        s_blk = max(8, ((s_blk // 2 + 7) // 8) * 8)
    return s_blk


def _pick_lane_block(hw, batch, target=512 * 128):
    """Fallback (HW not a multiple of 128): lane block = multiple of 128 (or
    full extent if HW < 128); ragged tail handled by the cdiv grid."""
    if hw <= 128:
        return hw
    t = min((hw // 128) * 128, target)
    while batch * _cdiv(hw, t) < 2 and t > 128:
        t = max(128, (t // 2 // 128) * 128)
    return t


def binnings_crvd_forward(x_nchw, groupn):
    """x_nchw: (B, C, H, W) float32.  groupn: (G, N, 1, 1) float32 parameter."""
    B, c, H, W = x_nchw.shape
    assert c == C
    HW = H * W

    # SMEM weight table laid out to match channel c = j*G + i: wng[j, i] = groupn[i, j].
    wng = jnp.transpose(groupn[:, :, 0, 0], (1, 0))           # (N, G)

    cost = pl.CostEstimate(
        flops=2 * B * HW * C,
        transcendentals=0,
        bytes_accessed=4 * (B * HW * (C + G) + N * G),
    )
    cparams = pltpu.CompilerParams(
        dimension_semantics=("parallel", "parallel"),
        vmem_limit_bytes=32 * 1024 * 1024,
    )

    if HW % 128 == 0:
        # Sublane- and lane-dense path: (B, N, G, HW//128, 128).
        s_total = HW // 128
        s_blk = _pick_sublane_block(s_total, B)
        x5 = x_nchw.reshape(B, N, G, s_total, 128)            # free reshape, no pad
        out = pl.pallas_call(
            _binning_kernel,
            out_shape=jax.ShapeDtypeStruct((B, G, s_total, 128), x_nchw.dtype),
            grid_spec=pltpu.PrefetchScalarGridSpec(
                num_scalar_prefetch=0,
                grid=(B, _cdiv(s_total, s_blk)),
                in_specs=[
                    pl.BlockSpec(memory_space=pltpu.MemorySpace.SMEM),
                    pl.BlockSpec((None, N, G, s_blk, 128),
                                 lambda b, s: (b, 0, 0, s, 0)),
                ],
                out_specs=pl.BlockSpec((None, G, s_blk, 128),
                                       lambda b, s: (b, 0, s, 0)),
            ),
            compiler_params=cparams,
            cost_estimate=cost,
        )(wng, x5)
        return out.reshape(B, G, H, W)

    # Fallback for HW not a multiple of 128: lane-blocked layout with a
    # cdiv grid; the ragged last block is masked by Pallas.
    t = _pick_lane_block(HW, B)
    x4 = x_nchw.reshape(B, N, G, HW)
    out = pl.pallas_call(
        _binning_kernel,
        out_shape=jax.ShapeDtypeStruct((B, G, HW), x_nchw.dtype),
        grid_spec=pltpu.PrefetchScalarGridSpec(
            num_scalar_prefetch=0,
            grid=(B, _cdiv(HW, t)),
            in_specs=[
                pl.BlockSpec(memory_space=pltpu.MemorySpace.SMEM),
                pl.BlockSpec((None, N, G, t), lambda b, s: (b, 0, 0, s)),
            ],
            out_specs=pl.BlockSpec((None, G, t), lambda b, s: (b, 0, s)),
        ),
        compiler_params=cparams,
        cost_estimate=cost,
    )(wng, x4)
    return out.reshape(B, G, H, W)


if __name__ == "__main__":
    key = jax.random.PRNGKey(0)
    kx, kw = jax.random.split(key)
    B, Hs, Ws = 2, 16, 16
    x = jax.random.normal(kx, (B, C, Hs, Ws), dtype=jnp.float32)

    # Module init is ones * 1/n; add a deterministic perturbation so the
    # channel/weight indexing is actually exercised by the correctness check.
    groupn = (jnp.full((G, N, 1, 1), 1.0 / N, dtype=jnp.float32)
              + 0.1 * jax.random.normal(kw, (G, N, 1, 1), dtype=jnp.float32))

    out = jax.block_until_ready(binnings_crvd_forward(x, groupn))

    # Reference (plain JAX) check of the 1x1-conv semantics.
    ref = jnp.stack(
        [sum(groupn[i, j, 0, 0] * x[:, i + j * G] for j in range(N))
         for i in range(G)],
        axis=1,
    )

    assert out.shape == (B, G, Hs, Ws), out.shape
    assert jnp.allclose(out, ref, atol=1e-5, rtol=1e-5)
    print("KERNEL_OK")
</pallas_src>

<mosaic_0001>
module attributes {stable_mosaic.version = 11 : i64} {
  func.func @_binning_kernel(%arg0: i32, %arg1: i32, %arg2: memref<4x4xf32, #tpu.memory_space<smem>>, %arg3: memref<1x4x4x2x128xf32, #tpu.memory_space<vmem>>, %arg4: memref<1x4x2x128xf32, #tpu.memory_space<vmem>>) attributes {dimension_semantics = [#tpu.dimension_semantics<parallel>, #tpu.dimension_semantics<parallel>], iteration_bounds = array<i64: 2, 1>, scalar_prefetch = 0 : i64, scratch_operands = 0 : i64, tpu.core_type = #tpu.core_type<tc>, window_params = [{transform_indices = @transform_0, window_bounds = array<i64: 4, 4>}, {transform_indices = @transform_1, window_bounds = array<i64: 1, 4, 4, 2, 128>}, {transform_indices = @transform_2, window_bounds = array<i64: 1, 4, 2, 128>}]} {
    %c0 = arith.constant 0 : index
    %c0_0 = arith.constant 0 : index
    %c0_1 = arith.constant 0 : index
    %c0_2 = arith.constant 0 : index
    %c0_3 = arith.constant 0 : index
    %0 = vector.load %arg3[%c0, %c0_0, %c0_1, %c0_2, %c0_3] : memref<1x4x4x2x128xf32, #tpu.memory_space<vmem>>, vector<1x1x1x2x128xf32>
    %1 = vector.shape_cast %0 : vector<1x1x1x2x128xf32> to vector<2x128xf32>
    %c0_4 = arith.constant 0 : index
    %c0_5 = arith.constant 0 : index
    %2 = memref.load %arg2[%c0_4, %c0_5] : memref<4x4xf32, #tpu.memory_space<smem>>
    %3 = vector.broadcast %2 : f32 to vector<2x128xf32>
    %4 = arith.mulf %1, %3 : vector<2x128xf32>
    %c0_6 = arith.constant 0 : index
    %c1 = arith.constant 1 : index
    %c0_7 = arith.constant 0 : index
    %c0_8 = arith.constant 0 : index
    %c0_9 = arith.constant 0 : index
    %5 = vector.load %arg3[%c0_6, %c1, %c0_7, %c0_8, %c0_9] : memref<1x4x4x2x128xf32, #tpu.memory_space<vmem>>, vector<1x1x1x2x128xf32>
    %6 = vector.shape_cast %5 : vector<1x1x1x2x128xf32> to vector<2x128xf32>
    %c1_10 = arith.constant 1 : index
    %c0_11 = arith.constant 0 : index
    %7 = memref.load %arg2[%c1_10, %c0_11] : memref<4x4xf32, #tpu.memory_space<smem>>
    %8 = vector.broadcast %7 : f32 to vector<2x128xf32>
    %9 = arith.mulf %6, %8 : vector<2x128xf32>
    %10 = arith.addf %4, %9 : vector<2x128xf32>
    %c0_12 = arith.constant 0 : index
    %c2 = arith.constant 2 : index
    %c0_13 = arith.constant 0 : index
    %c0_14 = arith.constant 0 : index
    %c0_15 = arith.constant 0 : index
    %11 = vector.load %arg3[%c0_12, %c2, %c0_13, %c0_14, %c0_15] : memref<1x4x4x2x128xf32, #tpu.memory_space<vmem>>, vector<1x1x1x2x128xf32>
    %12 = vector.shape_cast %11 : vector<1x1x1x2x128xf32> to vector<2x128xf32>
    %c2_16 = arith.constant 2 : index
    %c0_17 = arith.constant 0 : index
    %13 = memref.load %arg2[%c2_16, %c0_17] : memref<4x4xf32, #tpu.memory_space<smem>>
    %14 = vector.broadcast %13 : f32 to vector<2x128xf32>
    %15 = arith.mulf %12, %14 : vector<2x128xf32>
    %16 = arith.addf %10, %15 : vector<2x128xf32>
    %c0_18 = arith.constant 0 : index
    %c3 = arith.constant 3 : index
    %c0_19 = arith.constant 0 : index
    %c0_20 = arith.constant 0 : index
    %c0_21 = arith.constant 0 : index
    %17 = vector.load %arg3[%c0_18, %c3, %c0_19, %c0_20, %c0_21] : memref<1x4x4x2x128xf32, #tpu.memory_space<vmem>>, vector<1x1x1x2x128xf32>
    %18 = vector.shape_cast %17 : vector<1x1x1x2x128xf32> to vector<2x128xf32>
    %c3_22 = arith.constant 3 : index
    %c0_23 = arith.constant 0 : index
    %19 = memref.load %arg2[%c3_22, %c0_23] : memref<4x4xf32, #tpu.memory_space<smem>>
    %20 = vector.broadcast %19 : f32 to vector<2x128xf32>
    %21 = arith.mulf %18, %20 : vector<2x128xf32>
    %22 = arith.addf %16, %21 : vector<2x128xf32>
    %c0_24 = arith.constant 0 : index
    %c0_25 = arith.constant 0 : index
    %c0_26 = arith.constant 0 : index
    %c0_27 = arith.constant 0 : index
    %23 = vector.load %arg4[%c0_24, %c0_25, %c0_26, %c0_27] : memref<1x4x2x128xf32, #tpu.memory_space<vmem>>, vector<1x1x2x128xf32>
    %24 = vector.shape_cast %23 : vector<1x1x2x128xf32> to vector<2x128xf32>
    %25 = vector.shape_cast %22 : vector<2x128xf32> to vector<1x1x2x128xf32>
    tpu.vector_store %arg4[%c0_24, %c0_25, %c0_26, %c0_27], %25 {strides = array<i32>} : memref<1x4x2x128xf32, #tpu.memory_space<vmem>>, vector<1x1x2x128xf32>,
    %c0_28 = arith.constant 0 : index
    %c0_29 = arith.constant 0 : index
    %c1_30 = arith.constant 1 : index
    %c0_31 = arith.constant 0 : index
    %c0_32 = arith.constant 0 : index
    %26 = vector.load %arg3[%c0_28, %c0_29, %c1_30, %c0_31, %c0_32] : memref<1x4x4x2x128xf32, #tpu.memory_space<vmem>>, vector<1x1x1x2x128xf32>
    %27 = vector.shape_cast %26 : vector<1x1x1x2x128xf32> to vector<2x128xf32>
    %c0_33 = arith.constant 0 : index
    %c1_34 = arith.constant 1 : index
    %28 = memref.load %arg2[%c0_33, %c1_34] : memref<4x4xf32, #tpu.memory_space<smem>>
    %29 = vector.broadcast %28 : f32 to vector<2x128xf32>
    %30 = arith.mulf %27, %29 : vector<2x128xf32>
    %c0_35 = arith.constant 0 : index
    %c1_36 = arith.constant 1 : index
    %c1_37 = arith.constant 1 : index
    %c0_38 = arith.constant 0 : index
    %c0_39 = arith.constant 0 : index
    %31 = vector.load %arg3[%c0_35, %c1_36, %c1_37, %c0_38, %c0_39] : memref<1x4x4x2x128xf32, #tpu.memory_space<vmem>>, vector<1x1x1x2x128xf32>
    %32 = vector.shape_cast %31 : vector<1x1x1x2x128xf32> to vector<2x128xf32>
    %c1_40 = arith.constant 1 : index
    %c1_41 = arith.constant 1 : index
    %33 = memref.load %arg2[%c1_40, %c1_41] : memref<4x4xf32, #tpu.memory_space<smem>>
    %34 = vector.broadcast %33 : f32 to vector<2x128xf32>
    %35 = arith.mulf %32, %34 : vector<2x128xf32>
    %36 = arith.addf %30, %35 : vector<2x128xf32>
    %c0_42 = arith.constant 0 : index
    %c2_43 = arith.constant 2 : index
    %c1_44 = arith.constant 1 : index
    %c0_45 = arith.constant 0 : index
    %c0_46 = arith.constant 0 : index
    %37 = vector.load %arg3[%c0_42, %c2_43, %c1_44, %c0_45, %c0_46] : memref<1x4x4x2x128xf32, #tpu.memory_space<vmem>>, vector<1x1x1x2x128xf32>
    %38 = vector.shape_cast %37 : vector<1x1x1x2x128xf32> to vector<2x128xf32>
    %c2_47 = arith.constant 2 : index
    %c1_48 = arith.constant 1 : index
    %39 = memref.load %arg2[%c2_47, %c1_48] : memref<4x4xf32, #tpu.memory_space<smem>>
    %40 = vector.broadcast %39 : f32 to vector<2x128xf32>
    %41 = arith.mulf %38, %40 : vector<2x128xf32>
    %42 = arith.addf %36, %41 : vector<2x128xf32>
    %c0_49 = arith.constant 0 : index
    %c3_50 = arith.constant 3 : index
    %c1_51 = arith.constant 1 : index
    %c0_52 = arith.constant 0 : index
    %c0_53 = arith.constant 0 : index
    %43 = vector.load %arg3[%c0_49, %c3_50, %c1_51, %c0_52, %c0_53] : memref<1x4x4x2x128xf32, #tpu.memory_space<vmem>>, vector<1x1x1x2x128xf32>
    %44 = vector.shape_cast %43 : vector<1x1x1x2x128xf32> to vector<2x128xf32>
    %c3_54 = arith.constant 3 : index
    %c1_55 = arith.constant 1 : index
    %45 = memref.load %arg2[%c3_54, %c1_55] : memref<4x4xf32, #tpu.memory_space<smem>>
    %46 = vector.broadcast %45 : f32 to vector<2x128xf32>
    %47 = arith.mulf %44, %46 : vector<2x128xf32>
    %48 = arith.addf %42, %47 : vector<2x128xf32>
    %c0_56 = arith.constant 0 : index
    %c1_57 = arith.constant 1 : index
    %c0_58 = arith.constant 0 : index
    %c0_59 = arith.constant 0 : index
    %49 = vector.load %arg4[%c0_56, %c1_57, %c0_58, %c0_59] : memref<1x4x2x128xf32, #tpu.memory_space<vmem>>, vector<1x1x2x128xf32>
    %50 = vector.shape_cast %49 : vector<1x1x2x128xf32> to vector<2x128xf32>
    %51 = vector.shape_cast %48 : vector<2x128xf32> to vector<1x1x2x128xf32>
    tpu.vector_store %arg4[%c0_56, %c1_57, %c0_58, %c0_59], %51 {strides = array<i32>} : memref<1x4x2x128xf32, #tpu.memory_space<vmem>>, vector<1x1x2x128xf32>,
    %c0_60 = arith.constant 0 : index
    %c0_61 = arith.constant 0 : index
    %c2_62 = arith.constant 2 : index
    %c0_63 = arith.constant 0 : index
    %c0_64 = arith.constant 0 : index
    %52 = vector.load %arg3[%c0_60, %c0_61, %c2_62, %c0_63, %c0_64] : memref<1x4x4x2x128xf32, #tpu.memory_space<vmem>>, vector<1x1x1x2x128xf32>
    %53 = vector.shape_cast %52 : vector<1x1x1x2x128xf32> to vector<2x128xf32>
    %c0_65 = arith.constant 0 : index
    %c2_66 = arith.constant 2 : index
    %54 = memref.load %arg2[%c0_65, %c2_66] : memref<4x4xf32, #tpu.memory_space<smem>>
    %55 = vector.broadcast %54 : f32 to vector<2x128xf32>
    %56 = arith.mulf %53, %55 : vector<2x128xf32>
    %c0_67 = arith.constant 0 : index
    %c1_68 = arith.constant 1 : index
    %c2_69 = arith.constant 2 : index
    %c0_70 = arith.constant 0 : index
    %c0_71 = arith.constant 0 : index
    %57 = vector.load %arg3[%c0_67, %c1_68, %c2_69, %c0_70, %c0_71] : memref<1x4x4x2x128xf32, #tpu.memory_space<vmem>>, vector<1x1x1x2x128xf32>
    %58 = vector.shape_cast %57 : vector<1x1x1x2x128xf32> to vector<2x128xf32>
    %c1_72 = arith.constant 1 : index
    %c2_73 = arith.constant 2 : index
    %59 = memref.load %arg2[%c1_72, %c2_73] : memref<4x4xf32, #tpu.memory_space<smem>>
    %60 = vector.broadcast %59 : f32 to vector<2x128xf32>
    %61 = arith.mulf %58, %60 : vector<2x128xf32>
    %62 = arith.addf %56, %61 : vector<2x128xf32>
    %c0_74 = arith.constant 0 : index
    %c2_75 = arith.constant 2 : index
    %c2_76 = arith.constant 2 : index
    %c0_77 = arith.constant 0 : index
    %c0_78 = arith.constant 0 : index
    %63 = vector.load %arg3[%c0_74, %c2_75, %c2_76, %c0_77, %c0_78] : memref<1x4x4x2x128xf32, #tpu.memory_space<vmem>>, vector<1x1x1x2x128xf32>
    %64 = vector.shape_cast %63 : vector<1x1x1x2x128xf32> to vector<2x128xf32>
    %c2_79 = arith.constant 2 : index
    %c2_80 = arith.constant 2 : index
    %65 = memref.load %arg2[%c2_79, %c2_80] : memref<4x4xf32, #tpu.memory_space<smem>>
    %66 = vector.broadcast %65 : f32 to vector<2x128xf32>
    %67 = arith.mulf %64, %66 : vector<2x128xf32>
    %68 = arith.addf %62, %67 : vector<2x128xf32>
    %c0_81 = arith.constant 0 : index
    %c3_82 = arith.constant 3 : index
    %c2_83 = arith.constant 2 : index
    %c0_84 = arith.constant 0 : index
    %c0_85 = arith.constant 0 : index
    %69 = vector.load %arg3[%c0_81, %c3_82, %c2_83, %c0_84, %c0_85] : memref<1x4x4x2x128xf32, #tpu.memory_space<vmem>>, vector<1x1x1x2x128xf32>
    %70 = vector.shape_cast %69 : vector<1x1x1x2x128xf32> to vector<2x128xf32>
    %c3_86 = arith.constant 3 : index
    %c2_87 = arith.constant 2 : index
    %71 = memref.load %arg2[%c3_86, %c2_87] : memref<4x4xf32, #tpu.memory_space<smem>>
    %72 = vector.broadcast %71 : f32 to vector<2x128xf32>
    %73 = arith.mulf %70, %72 : vector<2x128xf32>
    %74 = arith.addf %68, %73 : vector<2x128xf32>
    %c0_88 = arith.constant 0 : index
    %c2_89 = arith.constant 2 : index
    %c0_90 = arith.constant 0 : index
    %c0_91 = arith.constant 0 : index
    %75 = vector.load %arg4[%c0_88, %c2_89, %c0_90, %c0_91] : memref<1x4x2x128xf32, #tpu.memory_space<vmem>>, vector<1x1x2x128xf32>
    %76 = vector.shape_cast %75 : vector<1x1x2x128xf32> to vector<2x128xf32>
    %77 = vector.shape_cast %74 : vector<2x128xf32> to vector<1x1x2x128xf32>
    tpu.vector_store %arg4[%c0_88, %c2_89, %c0_90, %c0_91], %77 {strides = array<i32>} : memref<1x4x2x128xf32, #tpu.memory_space<vmem>>, vector<1x1x2x128xf32>,
    %c0_92 = arith.constant 0 : index
    %c0_93 = arith.constant 0 : index
    %c3_94 = arith.constant 3 : index
    %c0_95 = arith.constant 0 : index
    %c0_96 = arith.constant 0 : index
    %78 = vector.load %arg3[%c0_92, %c0_93, %c3_94, %c0_95, %c0_96] : memref<1x4x4x2x128xf32, #tpu.memory_space<vmem>>, vector<1x1x1x2x128xf32>
    %79 = vector.shape_cast %78 : vector<1x1x1x2x128xf32> to vector<2x128xf32>
    %c0_97 = arith.constant 0 : index
    %c3_98 = arith.constant 3 : index
    %80 = memref.load %arg2[%c0_97, %c3_98] : memref<4x4xf32, #tpu.memory_space<smem>>
    %81 = vector.broadcast %80 : f32 to vector<2x128xf32>
    %82 = arith.mulf %79, %81 : vector<2x128xf32>
    %c0_99 = arith.constant 0 : index
    %c1_100 = arith.constant 1 : index
    %c3_101 = arith.constant 3 : index
    %c0_102 = arith.constant 0 : index
    %c0_103 = arith.constant 0 : index
    %83 = vector.load %arg3[%c0_99, %c1_100, %c3_101, %c0_102, %c0_103] : memref<1x4x4x2x128xf32, #tpu.memory_space<vmem>>, vector<1x1x1x2x128xf32>
    %84 = vector.shape_cast %83 : vector<1x1x1x2x128xf32> to vector<2x128xf32>
    %c1_104 = arith.constant 1 : index
    %c3_105 = arith.constant 3 : index
    %85 = memref.load %arg2[%c1_104, %c3_105] : memref<4x4xf32, #tpu.memory_space<smem>>
    %86 = vector.broadcast %85 : f32 to vector<2x128xf32>
    %87 = arith.mulf %84, %86 : vector<2x128xf32>
    %88 = arith.addf %82, %87 : vector<2x128xf32>
    %c0_106 = arith.constant 0 : index
    %c2_107 = arith.constant 2 : index
    %c3_108 = arith.constant 3 : index
    %c0_109 = arith.constant 0 : index
    %c0_110 = arith.constant 0 : index
    %89 = vector.load %arg3[%c0_106, %c2_107, %c3_108, %c0_109, %c0_110] : memref<1x4x4x2x128xf32, #tpu.memory_space<vmem>>, vector<1x1x1x2x128xf32>
    %90 = vector.shape_cast %89 : vector<1x1x1x2x128xf32> to vector<2x128xf32>
    %c2_111 = arith.constant 2 : index
    %c3_112 = arith.constant 3 : index
    %91 = memref.load %arg2[%c2_111, %c3_112] : memref<4x4xf32, #tpu.memory_space<smem>>
    %92 = vector.broadcast %91 : f32 to vector<2x128xf32>
    %93 = arith.mulf %90, %92 : vector<2x128xf32>
    %94 = arith.addf %88, %93 : vector<2x128xf32>
    %c0_113 = arith.constant 0 : index
    %c3_114 = arith.constant 3 : index
    %c3_115 = arith.constant 3 : index
    %c0_116 = arith.constant 0 : index
    %c0_117 = arith.constant 0 : index
    %95 = vector.load %arg3[%c0_113, %c3_114, %c3_115, %c0_116, %c0_117] : memref<1x4x4x2x128xf32, #tpu.memory_space<vmem>>, vector<1x1x1x2x128xf32>
    %96 = vector.shape_cast %95 : vector<1x1x1x2x128xf32> to vector<2x128xf32>
    %c3_118 = arith.constant 3 : index
    %c3_119 = arith.constant 3 : index
    %97 = memref.load %arg2[%c3_118, %c3_119] : memref<4x4xf32, #tpu.memory_space<smem>>
    %98 = vector.broadcast %97 : f32 to vector<2x128xf32>
    %99 = arith.mulf %96, %98 : vector<2x128xf32>
    %100 = arith.addf %94, %99 : vector<2x128xf32>
    %c0_120 = arith.constant 0 : index
    %c3_121 = arith.constant 3 : index
    %c0_122 = arith.constant 0 : index
    %c0_123 = arith.constant 0 : index
    %101 = vector.load %arg4[%c0_120, %c3_121, %c0_122, %c0_123] : memref<1x4x2x128xf32, #tpu.memory_space<vmem>>, vector<1x1x2x128xf32>
    %102 = vector.shape_cast %101 : vector<1x1x2x128xf32> to vector<2x128xf32>
    %103 = vector.shape_cast %100 : vector<2x128xf32> to vector<1x1x2x128xf32>
    tpu.vector_store %arg4[%c0_120, %c3_121, %c0_122, %c0_123], %103 {strides = array<i32>} : memref<1x4x2x128xf32, #tpu.memory_space<vmem>>, vector<1x1x2x128xf32>,
    return
  }
  func.func @transform_0(%arg0: i32, %arg1: i32) -> (i32, i32) {
    %c0_i32 = arith.constant 0 : i32
    %c0_i32_0 = arith.constant 0 : i32
    %c0_i32_1 = arith.constant 0 : i32
    return %c0_i32, %c0_i32_0 : i32, i32
  }
  func.func @transform_1(%arg0: i32, %arg1: i32) -> (i32, i32, i32, i32, i32) {
    %c0_i32 = arith.constant 0 : i32
    %c0_i32_0 = arith.constant 0 : i32
    %c0_i32_1 = arith.constant 0 : i32
    %c0_i32_2 = arith.constant 0 : i32
    return %arg0, %c0_i32, %c0_i32_0, %arg1, %c0_i32_1 : i32, i32, i32, i32, i32
  }
  func.func @transform_2(%arg0: i32, %arg1: i32) -> (i32, i32, i32, i32) {
    %c0_i32 = arith.constant 0 : i32
    %c0_i32_0 = arith.constant 0 : i32
    %c0_i32_1 = arith.constant 0 : i32
    return %arg0, %c0_i32, %arg1, %c0_i32_0 : i32, i32, i32, i32
  }
}

</mosaic_0001>

<bundles_post_ra>
// kernel: tpu_custom_call.1
= control target key start
LH: loop header
LB: loop body
LE: loop exit
PB: predicated region body
PF: predicated region fallthrough
CT: control target
= control target key end

     0   :  { %7 = vsyncpa [#allocation5], 0  ;;  %s938_s0 = inlined_call_operand.hbm [shape: f32[4,4], index: 0, kind: input, shape index: {}]   ;;  %s939_s1 = inlined_call_operand.hbm [shape: f32[2,4,4,2,128], index: 1, kind: input, shape index: {}]   ;;  %s940_s2 = inlined_call_operand.hbm [shape: f32[2,4,2,128], index: 2, kind: output, shape index: {}]  }
   0x1   :  { %8 = vsyncpa [#allocation3], 0 }
   0x2   :  { %10 = vsyncpa [#allocation3 + $0x1], 0 }
   0x3   :  { %11 = vsyncpa [#allocation4], 0 }
   0x4   :  { %13 = vsyncpa [#allocation4 + $0x1], 0  ;;  %s683_s9 = smov 0   ;;  %s685_s10 = smov 0  }
   0x5   :  { %s687_s11 = smov 0   ;;  %s689_s12 = smov 0  }
   0x6   :  { %s691_s13 = smov 0   ;;  %s693_s14 = smov 0  }
   0x7 LB: > { %s401_s15 = sadd.s32 4294967295, %s659_s14   ;;  %s402_s16 = sadd.s32 4294967294, %s659_s14   ;;  %s659_s14 = sphi %s693_s14, %s19_s14   ;;  %s655_s13 = sphi %s691_s13, %s960_s13   ;;  %s651_s12 = sphi %s689_s12, %s959_s12   ;;  %s647_s11 = sphi %s687_s11, %s958_s11   ;;  %s643_s10 = sphi %s685_s10, %s957_s10   ;;  %s639_s9 = sphi %s683_s9, %s956_s9  }
   0x8   : > { %s61_s17 = sadd.s32 1, %s647_s11  ;;  %p68_p0 = scmp.ne.s32.totalorder %s647_s11, %s643_s10 }
   0x9   : > { %p69_p1 = scmp.eq.s32.totalorder %s659_s14, 0  ;;  %p74_p2 = scmp.ne.s32.totalorder %s643_s10, %s639_s9 }
   0xa   : > { %p721_p3 = scmp.eq.s32.totalorder %s401_s15, 0  ;;  %p100_p4 = scmp.eq.s32.totalorder %s401_s15, 1 }
   0xb   : > { %p70_p5 = por %p69_p1, %p68_p0  ;;  %p106_p6 = scmp.eq.s32.totalorder %s402_s16, 1 }
   0xc   : > { %s945_s18 = scalar_select %p721_p3, 1, 0 }
   0xd   : > { %p727_p7 = por %p721_p3, %p74_p2  ;;  %p731_p8 = por %p100_p4, %p68_p0 }
   0xe   : > { %p735_p9 = por %p106_p6, %p74_p2  ;;  %p403_p10 = scmp.ge.s32.totalorder %s659_s14, 1 }
   0xf   : > { %s946_s19 = scalar_select %p727_p7, 1, 0 }
  0x10   : > { %s947_s20 = scalar_select %p731_p8, 1, 0 }
  0x11   : > { %s948_s21 = scalar_select %p735_p9, 1, 0 }
  0x12   : > { %p113_p11 = scmp.lt.s32.totalorder %s659_s14, 3  ;;  %p474_p1 = scmp.lt.s32.totalorder %s659_s14, 2 }
  0x13   : > { %s135_s23 = sand.u32 1, %s647_s11   ;;  %s31_s25 = sadd.s32 1, %s655_s13 }
  0x14   : > { %p742_p13 = pnand %p403_p10, %p113_p11  ;;  %p750_p0 = pnand %p474_p1, %p70_p5 }
  0x15   : > { %s406_s26 = sshll.u32 %s135_s23, 5  ;;  %p33_p4 = scmp.ge.s32.totalorder %s31_s25, 2 }
  0x16   : > { %p461_p7 = pneg %p742_p13  ;;  %s530_s29 = scalar_lea.hbm %s938_s0, 64 }
  0x17   : > { %p531_p6 = scmp.ne.s32.totalorder %s938_s0, %s530_s29  ;;  %p537_p5 = scmp.lt.u32.totalorder %s530_s29, %s938_s0 }
  0x18   : > { %p462_p2 = pnand %p461_p7, %p721_p3 }
  0x1a   : > { %p532_p10 = pneg %p462_p2 }
  0x1c   : > { %p533_p11 = pnand %p532_p10, %p531_p6 }
  0x1e   : > { %p534_p12 = pneg %p533_p11 }
  0x20   : > { %p539_p1 = pnand %p537_p5, %p534_p12 }
  0x22   : > { %542 = shalt.err (!%p539_p1)
}
  0x23   : > { %s661_s6 = smov [#allocation2]   ;;  %s962_s25 = smov (%p33_p4, %s31_s25), 0 }
  0x24   : > { %464 = dma.hbm_to_smem (!%p462_p2), %s938_s0, 64, %s661_s6, [#allocation5]  }
  0x25   : > { %s451_s15 = sshll.u32 %s655_s13, 9  ;;  %s56_s16 = ssub.s32 %s655_s13, %s962_s25 }
  0x26   : > { %s777_s29 = scalar_lea.hbm %s939_s1, %s451_s15  ;;  %p59_p7 = scmp.eq.s32.totalorder %s56_s16, 0 }
  0x27   : > { %s139_s30 = scalar_lea.vmem [#allocation6], %s406_s26  ;;  %s786_s5 = scalar_lea.sflag [#allocation3], %s135_s23 }
  0x28   : > { %s147_s3 = sshll.u32 %s139_s30, 4  ;;  %s543_s6 = scalar_lea.hbm %s777_s29, 512  ;;  %s779_s3 = int_to_ptr.vmem [resolvable:$true] %s147_s3 }
  0x29   : > { %s784_s4 = scalar_select %p59_p7, %s647_s11, %s61_s17  }
  0x2a   : > { %p544_p12 = scmp.ne.s32.totalorder %s777_s29, %s543_s6  ;;  %p545_p2 = pneg %p750_p0 }
  0x2b   : > { %s548_s26 = scalar_lea.hbm %s939_s1, 1024  ;;  %p549_p10 = scmp.lt.u32.totalorder %s777_s29, %s939_s1 }
  0x2c   : > { %p546_p4 = pnand %p545_p2, %p544_p12  ;;  %p550_p11 = scmp.lt.u32.totalorder %s548_s26, %s543_s6 }
  0x2d   : > { %p552_p1 = scmp.lt.u32.totalorder %s543_s6, %s777_s29 }
  0x2e   : > { %p547_p6 = pneg %p546_p4  ;;  %p551_p5 = por %p550_p11, %p549_p10 }
  0x30   : > { %p553_p7 = por %p552_p1, %p551_p5 }
  0x32   : > { %p554_p9 = pnand %p553_p7, %p547_p6 }
  0x34   : > { %557 = shalt.err (!%p554_p9)
}
  0x35   : > { %s558_s17 = scalar_lea.vmem %s779_s3, 512  ;;  %s662_s23 = smov [#allocation6]  }
  0x36   : > { %p559_p12 = scmp.ne.s32.totalorder %s779_s3, %s558_s17  ;;  %s563_s27 = sshll.u32 %s662_s23, 4  ;;  %s564_s27 = int_to_ptr.vmem [resolvable:$false] %s563_s27 }
  0x37   : > { %s565_s28 = scalar_lea.vmem %s564_s27, 1024  ;;  %p566_p3 = scmp.lt.s32.totalorder %s779_s3, %s564_s27 }
  0x38   : > { %p561_p4 = pnand %p559_p12, %p545_p2  ;;  %p567_p10 = scmp.lt.s32.totalorder %s565_s28, %s558_s17 }
  0x3a   : > { %p562_p8 = pneg %p561_p4  ;;  %p568_p11 = por %p567_p10, %p566_p3 }
  0x3c   : > { %p569_p5 = pnand %p568_p11, %p562_p8 }
  0x3e   : > { %572 = shalt.err (!%p569_p5)
}
  0x3f   : > { %s663_s30 = smov 32   ;;  %s664_s6 = smov 2  }
  0x40   : > { %468 = dma.hbm_to_vmem [thread:$0]  (!%p750_p0), %s777_s29, 512, %s779_s3, %s786_s5, %s663_s30, %s663_s30, %s664_s6  }
  0x41   : > { %159 = sbr.rel (%p742_p13) target bundleno = 117 (0x75), region = 28  ;;  %p951_p9 = scmp.ne.s32.totalorder (!%p742_p13), %s945_s18, 0 }
  0x48   : > { %626 = dma.done.wait (%p951_p9), [#allocation5], 64  }
  0x49   : > { %628 = vsyncadd (%p951_p9), [#allocation5], 4294967232  ;;  %s821_s7 = sand.u32 1, %s643_s10   ;;  %p952_p3 = scmp.ne.s32.totalorder %s946_s19, 0 }
  0x4a   : > { %s411_s8 = sshll.u32 %s821_s7, 5  ;;  %s166_s26 = scalar_lea.sflag [#allocation3], %s821_s7 }
  0x4b   : > { %s825_s15 = scalar_lea.vmem [#allocation6], %s411_s8 }
  0x4c   : > { %630 = dma.done.wait (%p952_p3), %s166_s26, 512  }
  0x4d   : > { %632 = vsyncadd (%p952_p3), %s166_s26, 4294966784 }
  0x4e   : > { %174 = sfence }
  0x4f   : > { %s192_s22 = sld [smem:[#allocation2]]  ;;  %v191_v0 = vld [vmem:[%s825_s15] sm:$0x3]  ;;  %s420_s3 = sld [smem:[#allocation2 + $0x1]]  ;;  %v413_v1 = vld [vmem:[%s825_s15 + $0x8] sm:$0x3] }
  0x50   : > { %s414_s18 = sld [smem:[#allocation2 + $0x80]]  ;;  %s833_s5 = sld [smem:[#allocation2 + $0x81]]  ;;  %v415_v3 = vld [vmem:[%s825_s15 + $0x10] sm:$0x3]  ;;  %v417_v6 = vld [vmem:[%s825_s15 + $0x18] sm:$0x3] }
  0x51   : > { %s416_s24 = sld [smem:[#allocation2 + $0x100]]  ;;  %s835_s16 = sld [smem:[#allocation2 + $0x101]]  ;;  %v419_v9 = vld [vmem:[%s825_s15 + $0x2] sm:$0x3]  ;;  %v421_v12 = vld [vmem:[%s825_s15 + $0xa] sm:$0x3] }
  0x52   : > { %s418_s29 = sld [smem:[#allocation2 + $0x180]]  ;;  %s838_s19 = sld [smem:[#allocation2 + $0x181]]  ;;  %v423_v13 = vld [vmem:[%s825_s15 + $0x12] sm:$0x3]  ;;  %v425_v17 = vld [vmem:[%s825_s15 + $0x1a] sm:$0x3] }
  0x53   : > { %s840_s17 = sld [smem:[#allocation2 + $0x2]]  ;;  %s412_s23 = sshll.u32 %s821_s7, 3  ;;  %v428_v21 = vld [vmem:[%s825_s15 + $0x4] sm:$0x3]  ;;  %v430_v22 = vld [vmem:[%s825_s15 + $0xc] sm:$0x3] }
  0x54   : > { %s844_s27 = sld [smem:[#allocation2 + $0x82]]  ;;  %s853_s6 = sld [smem:[#allocation2 + $0x3]]  ;;  %v432_v30 = vld [vmem:[%s825_s15 + $0x14] sm:$0x3]  ;;  %v434_v31 = vld [vmem:[%s825_s15 + $0x1c] sm:$0x3] }
  0x55   : > { %v193_v2 = vstv %s192_s22  ;;  %s847_s28 = sld [smem:[#allocation2 + $0x102]]  ;;  %v217_v16 = vstv %s420_s3  ;;  %s856_s8 = sld [smem:[#allocation2 + $0x83]]  ;;  %v437_v36 = vld [vmem:[%s825_s15 + $0x6] sm:$0x3]  ;;  %v439_v37 = vld [vmem:[%s825_s15 + $0xe] sm:$0x3] }
  0x56   : > { %v194_v4 = vmul.f32 %v193_v2, %v191_v0  ;;  %v198_v5 = vstv %s414_s18  ;;  %s849_s30 = sld [smem:[#allocation2 + $0x182]]  ;;  %s858_s26 = sld [smem:[#allocation2 + $0x103]]  ;;  %v218_v18 = vmul.f32 %v419_v9, %v217_v16  ;;  %v222_v19 = vstv %s833_s5  ;;  %v441_v41 = vld [vmem:[%s825_s15 + $0x16] sm:$0x3]  ;;  %v443_v49 = vld [vmem:[%s825_s15 + $0x1e] sm:$0x3] }
  0x57   : > { %v199_v7 = vmul.f32 %v413_v1, %v198_v5  ;;  %v204_v8 = vstv %s416_s24  ;;  %v228_v20 = vstv %s835_s16  ;;  %s864_s22 = sld [smem:[#allocation2 + $0x183]]  ;;  %v223_v24 = vmul.f32 %v421_v12, %v222_v19  ;;  %s190_s18 = scalar_lea.vmem [#allocation7], %s412_s23 }
  0x58   : > { %v205_v10 = vmul.f32 %v415_v3, %v204_v8  ;;  %v210_v11 = vstv %s418_s29  ;;  %v229_v25 = vmul.f32 %v423_v13, %v228_v20  ;;  %v234_v26 = vstv %s838_s19  ;;  %s304_s24 = sshll.u32 %s190_s18, 4  ;;  %s452_s29 = sshll.u32 %s651_s12, 7  ;;  %s884_s24 = int_to_ptr.vmem [resolvable:$true] %s304_s24 }
  0x59   : > { %v200_v14 = vadd.f32 %v199_v7, %v194_v4  ;;  %v211_v15 = vmul.f32 %v417_v6, %v210_v11  ;;  %v235_v27 = vmul.f32 %v425_v17, %v234_v26  ;;  %v242_v28 = vstv %s840_s17  ;;  %s889_s5 = scalar_lea.hbm %s940_s2, %s452_s29  ;;  %s290_s16 = scalar_lea.sflag [#allocation4], %s821_s7 }
  0x5a   : > { %v247_v29 = vstv %s844_s27  ;;  %v224_v33 = vadd.f32 %v223_v24, %v218_v18  ;;  %v243_v34 = vmul.f32 %v428_v21, %v242_v28  ;;  %v267_v40 = vstv %s853_s6  ;;  %s573_s19 = scalar_lea.vmem %s884_s24, 128  ;;  %p953_p13 = scmp.ne.s32.totalorder %s947_s20, 0 }
  0x5b   : > { %v206_v23 = vadd.f32 %v205_v10, %v200_v14  ;;  %v248_v35 = vmul.f32 %v430_v22, %v247_v29  ;;  %v253_v38 = vstv %s847_s28  ;;  %v268_v46 = vmul.f32 %v437_v36, %v267_v40  ;;  %p574_p8 = scmp.ne.s32.totalorder %s884_s24, %s573_s19  ;;  %s665_s12 = smov [#allocation7]  }
  0x5c   : > { %v259_v39 = vstv %s849_s30  ;;  %v230_v42 = vadd.f32 %v229_v25, %v224_v33  ;;  %v254_v44 = vmul.f32 %v432_v30, %v253_v38  ;;  %v272_v47 = vstv %s856_s8  ;;  %s577_s17 = sshll.u32 %s665_s12, 4  ;;  %s578_s17 = int_to_ptr.vmem [resolvable:$false] %s577_s17 }
  0x5d   : > { %v212_v32 = vadd.f32 %v211_v15, %v206_v23  ;;  %v249_v43 = vadd.f32 %v248_v35, %v243_v34  ;;  %v260_v45 = vmul.f32 %v434_v31, %v259_v39  ;;  %v278_v48 = vstv %s858_s26  ;;  %p575_p0 = pnand %p574_p8, %p953_p13  ;;  %s579_s23 = scalar_lea.vmem %s578_s17, 256 }
  0x5e   : > { %v284_v50 = vstv %s864_s22  ;;  %v236_v51 = vadd.f32 %v235_v27, %v230_v42  ;;  %v273_v53 = vmul.f32 %v439_v37, %v272_v47  ;;  %v279_v54 = vmul.f32 %v441_v41, %v278_v48  ;;  %p580_p6 = scmp.lt.s32.totalorder %s884_s24, %s578_s17  ;;  %p581_p1 = scmp.lt.s32.totalorder %s579_s23, %s573_s19 }
  0x5f   : > { %213 = vst [vmem:[%s190_s18] sm:$0x3] %v212_v32  ;;  %v255_v52 = vadd.f32 %v254_v44, %v249_v43  ;;  %v285_v57 = vmul.f32 %v443_v49, %v284_v50  ;;  %p576_p2 = pneg %p575_p0 }
  0x60   : > { %427 = vst [vmem:[%s190_s18 + $0x2] sm:$0x3] %v236_v51  ;;  %v274_v56 = vadd.f32 %v273_v53, %v268_v46  ;;  %p582_p7 = por %p581_p1, %p580_p6 }
  0x61   : > { %v261_v55 = vadd.f32 %v260_v45, %v255_v52 }
  0x62   : > { %v280_v58 = vadd.f32 %v279_v54, %v274_v56  ;;  %p583_p12 = pnand %p582_p7, %p576_p2 }
  0x63   : > { %436 = vst [vmem:[%s190_s18 + $0x4] sm:$0x3] %v261_v55 }
  0x64   : > { %v286_v59 = vadd.f32 %v285_v57, %v280_v58 }
  0x66   : > { %445 = vst [vmem:[%s190_s18 + $0x6] sm:$0x3] %v286_v59 }
  0x67   : > { %586 = shalt.err (!%p583_p12)
}
  0x68   : > { %s587_s27 = scalar_lea.hbm %s889_s5, 128  ;;  %s591_s6 = scalar_lea.hbm %s940_s2, 256 }
  0x69   : > { %p588_p4 = scmp.ne.s32.totalorder %s889_s5, %s587_s27  ;;  %p592_p5 = scmp.lt.u32.totalorder %s889_s5, %s940_s2 }
  0x6a   : > { %p593_p9 = scmp.lt.u32.totalorder %s591_s6, %s587_s27  ;;  %p595_p8 = scmp.lt.u32.totalorder %s587_s27, %s889_s5 }
  0x6b   : > { %p589_p10 = pnand %p588_p4, %p953_p13 }
  0x6c   : > { %p594_p3 = por %p593_p9, %p592_p5 }
  0x6d   : > { %p590_p11 = pneg %p589_p10 }
  0x6e   : > { %p596_p0 = por %p595_p8, %p594_p3 }
  0x70   : > { %p597_p2 = pnand %p596_p0, %p590_p11 }
  0x72   : > { %600 = shalt.err (!%p597_p2)
}
  0x73   : > { %s666_s22 = smov 32   ;;  %s667_s18 = smov 2  }
  0x74   : > { %459 = dma.vmem_to_hbm [thread:$0]  (%p953_p13), %s884_s24, 128, %s889_s5, %s290_s16, %s666_s22, %s666_s22, %s667_s18  }
  0x75 PF: > { %s319_s29 = sand.u32 1, %s639_s9   ;;  %p954_p6 = scmp.ne.s32.totalorder %s948_s21, 0 }
  0x76   : > { %p955_p1 = scmp.ge.s32.totalorder %s659_s14, 2  ;;  %s320_s15 = scalar_lea.sflag [#allocation4], %s319_s29 }
  0x78   : > { %p470_p7 = pnand %p955_p1, %p954_p6 }
  0x7a   : > { %634 = dma.done.wait (!%p470_p7), %s320_s15, 128  }
  0x7b   : > { %636 = vsyncadd (!%p470_p7), %s320_s15, 4294967168  ;;  %s19_s14 = sadd.s32 1, %s659_s14   ;;  %s956_s9 = smov %s643_s10 }
  0x7c   : > { %p16_p12 = scmp.ge.s32.totalorder %s19_s14, 4   ;;  %s957_s10 = smov %s647_s11 }
  0x7d   : > { %s958_s11 = smov %s784_s4  ;;  %s959_s12 = smov %s655_s13 }
  0x7e   : > { %s960_s13 = smov %s962_s25  ;;  %18 = sbr.rel (!%p16_p12) target bundleno = 7 (0x7), region = 96 }
  0x85   :  { %325 = vsyncpa [#allocation3], 1 }
  0x86   :  { %327 = vsyncpa [#allocation3 + $0x1], 1 }
  0x87   :  { %328 = vsyncpa [#allocation4], 1 }
  0x88   :  { %330 = vsyncpa [#allocation4 + $0x1], 1 }
  0x89   :  { %331 = vsyncpa [#allocation5], 1 }
  0x8a   :  { %333 = vsyncpa [#allocation5 + $0x1], 1 }

</bundles_post_ra>
